<compile_context>
chip_gen: v7x
topology: tpu7x:2x2x1
jax: 0.10.0
libtpu: 0.0.40
codegen_flags: <defaults>
</compile_context>

<pallas_src>
import jax
import jax.numpy as jnp
from jax.experimental import pallas as pl
from jax.experimental.pallas import tpu as pltpu

_LANE = 128


def _round_up(n, m):
    return ((n + m - 1) // m) * m


def _mlp_kernel(x_ref, w1_ref, b1_ref, w2_ref, b2_ref, w3_ref, b3_ref,
                w4_ref, b4_ref, o_ref):
    # Feature-major: batch in lanes, features in sublanes.
    # x: (1, bt) f32, w_i: (out, in) (w2..w4 pre-cast to bf16), b_i: (out, 1) f32.
    x = x_ref[...]                                                   # (1, bt)

    # Layer 1: contraction dim is 1 -> VPU broadcast multiply-add (f32).
    h1 = jnp.maximum(w1_ref[...] * x + b1_ref[...], 0.0)            # (32, bt)

    # Layers 2-4 on the MXU: bf16 operands, f32 accumulation.
    h2 = jnp.maximum(
        jnp.dot(w2_ref[...], h1.astype(jnp.bfloat16),
                preferred_element_type=jnp.float32) + b2_ref[...], 0.0)   # (64, bt)

    h3 = jnp.maximum(
        jnp.dot(w3_ref[...], h2.astype(jnp.bfloat16),
                preferred_element_type=jnp.float32) + b3_ref[...], 0.0)   # (32, bt)

    # Final layer: lane-dense (num_angle, bt) store, no padding needed.
    o_ref[...] = (
        jnp.dot(w4_ref[...], h3.astype(jnp.bfloat16),
                preferred_element_type=jnp.float32) + b4_ref[...])


def angle_traj_net_forward(x, params, *, batch_tile=1024):
    """x: (B, 1) float32.  params: (out,in) weights, (out,1) biases (nn.Linear layout)."""
    B = x.shape[0]
    num_angle = params["w4"].shape[0]

    # (B, 1) -> (1, B): identical row-major memory layout, so this is free.
    xT = x.reshape(1, B)

    if B <= _LANE:
        # Single grid step: full-extent blocks satisfy the (8,128) rule for any B,
        # no batch padding, no wrapper slice.
        bt, B_pad = B, B
    else:
        # Multi-step: block last dim must be a multiple of 128.
        bt = _round_up(min(batch_tile, B), _LANE)
        # v7x: guarantee >= 2 grid steps so "parallel" shards across both TCs.
        bt = min(bt, _round_up(pl.cdiv(B, 2), _LANE))
        B_pad = _round_up(B, bt)
        if B_pad != B:
            xT = jnp.pad(xT, ((0, 0), (0, B_pad - B)))   # zero cols -> finite outputs

    grid = (B_pad // bt,)

    # bf16 MXU operands: cast the weights once here (not per grid step).
    w1, b1 = params["w1"], params["b1"]
    w2, b2 = params["w2"].astype(jnp.bfloat16), params["b2"]
    w3, b3 = params["w3"].astype(jnp.bfloat16), params["b3"]
    w4, b4 = params["w4"].astype(jnp.bfloat16), params["b4"]

    def resident(arr):
        # Full-array block, constant index_map -> fetched once, stays resident.
        return pl.BlockSpec(arr.shape, lambda i: (0, 0))

    flops = 2 * B_pad * (1 * 32 + 32 * 64 + 64 * 32 + 32 * num_angle)
    weight_bytes = (4 * (32 * 1 + 32) + 2 * 64 * 32 + 4 * 64
                    + 2 * 32 * 64 + 4 * 32 + 2 * num_angle * 32 + 4 * num_angle)
    cost = pl.CostEstimate(
        flops=flops,
        transcendentals=0,
        bytes_accessed=4 * B_pad + 4 * num_angle * B_pad + weight_bytes)

    out = pl.pallas_call(
        _mlp_kernel,
        out_shape=jax.ShapeDtypeStruct((num_angle, B_pad), jnp.float32),
        grid_spec=pltpu.PrefetchScalarGridSpec(
            num_scalar_prefetch=0,
            grid=grid,
            in_specs=[
                pl.BlockSpec((1, bt), lambda i: (0, i)),   # x, lane-dense
                resident(w1), resident(b1),
                resident(w2), resident(b2),
                resident(w3), resident(b3),
                resident(w4), resident(b4),
            ],
            out_specs=pl.BlockSpec((num_angle, bt), lambda i: (0, i)),
        ),
        compiler_params=pltpu.CompilerParams(
            dimension_semantics=("parallel",)),
        cost_estimate=cost,
    )(xT, w1, b1, w2, b2, w3, b3, w4, b4)

    # Back to the module's (B, num_angle) layout; touches only B*num_angle
    # f32 values (same order as the kernel's own output writeback).
    return out[:, :B].T


def init_params(key, num_angle):
    """Deterministic init mirroring nn.Linear; weights kept (out, in), bias (out, 1)."""
    dims = [(1, 32), (32, 64), (64, 32), (32, num_angle)]
    params = {}
    for idx, (fan_in, fan_out) in enumerate(dims, start=1):
        key, kw, kb = jax.random.split(key, 3)
        bound = 1.0 / jnp.sqrt(jnp.float32(fan_in))
        params[f"w{idx}"] = jax.random.uniform(
            kw, (fan_out, fan_in), jnp.float32, -bound, bound)
        params[f"b{idx}"] = jax.random.uniform(
            kb, (fan_out, 1), jnp.float32, -bound, bound)
    return params


def reference_forward(x, params):
    h = x
    for idx in range(1, 4):
        W, b = params[f"w{idx}"], params[f"b{idx}"]
        h = jnp.maximum(h @ W.T + b[:, 0], 0.0)
    return h @ params["w4"].T + params["b4"][:, 0]


if __name__ == "__main__":
    key = jax.random.PRNGKey(0)
    key, kx = jax.random.split(key)

    num_angle = 16
    batch = 64
    x = jax.random.normal(kx, (batch, 1), jnp.float32)

    params = init_params(key, num_angle)

    out = angle_traj_net_forward(x, params)
    out = jax.block_until_ready(out)

    ref = reference_forward(x, params)
    assert out.shape == (batch, num_angle)
    # bf16 MXU operands (f32 accumulation) -> small deviation from the f32 reference.
    assert jnp.allclose(out, ref, atol=5e-2, rtol=5e-2)
    assert bool(jnp.all(jnp.isfinite(out)))

    print("KERNEL_OK")
</pallas_src>

<mosaic_0001>
module attributes {stable_mosaic.version = 11 : i64} {
  func.func @_mlp_kernel(%arg0: i32, %arg1: memref<1x64xf32, #tpu.memory_space<vmem>>, %arg2: memref<32x1xf32, #tpu.memory_space<vmem>>, %arg3: memref<32x1xf32, #tpu.memory_space<vmem>>, %arg4: memref<64x32xbf16, #tpu.memory_space<vmem>>, %arg5: memref<64x1xf32, #tpu.memory_space<vmem>>, %arg6: memref<32x64xbf16, #tpu.memory_space<vmem>>, %arg7: memref<32x1xf32, #tpu.memory_space<vmem>>, %arg8: memref<16x32xbf16, #tpu.memory_space<vmem>>, %arg9: memref<16x1xf32, #tpu.memory_space<vmem>>, %arg10: memref<16x64xf32, #tpu.memory_space<vmem>>) attributes {dimension_semantics = [#tpu.dimension_semantics<parallel>], iteration_bounds = array<i64: 1>, scalar_prefetch = 0 : i64, scratch_operands = 0 : i64, tpu.core_type = #tpu.core_type<tc>, window_params = [{transform_indices = @transform_0, window_bounds = array<i64: 1, 64>}, {pipeline_mode = #tpu.pipeline_mode<synchronous>, transform_indices = @transform_1, window_bounds = array<i64: 32, 1>}, {pipeline_mode = #tpu.pipeline_mode<synchronous>, transform_indices = @transform_2, window_bounds = array<i64: 32, 1>}, {pipeline_mode = #tpu.pipeline_mode<synchronous>, transform_indices = @transform_3, window_bounds = array<i64: 64, 32>}, {pipeline_mode = #tpu.pipeline_mode<synchronous>, transform_indices = @transform_4, window_bounds = array<i64: 64, 1>}, {pipeline_mode = #tpu.pipeline_mode<synchronous>, transform_indices = @transform_5, window_bounds = array<i64: 32, 64>}, {pipeline_mode = #tpu.pipeline_mode<synchronous>, transform_indices = @transform_6, window_bounds = array<i64: 32, 1>}, {pipeline_mode = #tpu.pipeline_mode<synchronous>, transform_indices = @transform_7, window_bounds = array<i64: 16, 32>}, {pipeline_mode = #tpu.pipeline_mode<synchronous>, transform_indices = @transform_8, window_bounds = array<i64: 16, 1>}, {transform_indices = @transform_9, window_bounds = array<i64: 16, 64>}]} {
    %c0 = arith.constant 0 : index
    %c0_0 = arith.constant 0 : index
    %0 = vector.load %arg1[%c0, %c0_0] : memref<1x64xf32, #tpu.memory_space<vmem>>, vector<1x64xf32>
    %c0_1 = arith.constant 0 : index
    %c0_2 = arith.constant 0 : index
    %1 = vector.load %arg2[%c0_1, %c0_2] : memref<32x1xf32, #tpu.memory_space<vmem>>, vector<32x1xf32>
    %2 = vector.broadcast %1 : vector<32x1xf32> to vector<32x64xf32>
    %3 = vector.broadcast %0 : vector<1x64xf32> to vector<32x64xf32>
    %4 = arith.mulf %2, %3 : vector<32x64xf32>
    %c0_3 = arith.constant 0 : index
    %c0_4 = arith.constant 0 : index
    %5 = vector.load %arg3[%c0_3, %c0_4] : memref<32x1xf32, #tpu.memory_space<vmem>>, vector<32x1xf32>
    %6 = vector.broadcast %5 : vector<32x1xf32> to vector<32x64xf32>
    %7 = arith.addf %4, %6 : vector<32x64xf32>
    %cst = arith.constant 0.000000e+00 : f32
    %8 = vector.broadcast %cst : f32 to vector<32x64xf32>
    %9 = arith.maximumf %7, %8 : vector<32x64xf32>
    %c0_5 = arith.constant 0 : index
    %c0_6 = arith.constant 0 : index
    %10 = vector.load %arg4[%c0_5, %c0_6] : memref<64x32xbf16, #tpu.memory_space<vmem>>, vector<64x32xbf16>
    %11 = arith.truncf %9 : vector<32x64xf32> to vector<32x64xbf16>
    %cst_7 = arith.constant dense<0.000000e+00> : vector<64x64xf32>
    %12 = tpu.matmul %10, %11, %cst_7 {dimension_numbers = #tpu.dot_dimension_numbers<[1], [0], [0], [1], [0, 0, 1, 1], [], []>} : vector<64x32xbf16>, vector<32x64xbf16>, vector<64x64xf32> -> vector<64x64xf32>
    %c0_8 = arith.constant 0 : index
    %c0_9 = arith.constant 0 : index
    %13 = vector.load %arg5[%c0_8, %c0_9] : memref<64x1xf32, #tpu.memory_space<vmem>>, vector<64x1xf32>
    %14 = vector.broadcast %13 : vector<64x1xf32> to vector<64x64xf32>
    %15 = arith.addf %12, %14 : vector<64x64xf32>
    %cst_10 = arith.constant 0.000000e+00 : f32
    %16 = vector.broadcast %cst_10 : f32 to vector<64x64xf32>
    %17 = arith.maximumf %15, %16 : vector<64x64xf32>
    %c0_11 = arith.constant 0 : index
    %c0_12 = arith.constant 0 : index
    %18 = vector.load %arg6[%c0_11, %c0_12] : memref<32x64xbf16, #tpu.memory_space<vmem>>, vector<32x64xbf16>
    %19 = arith.truncf %17 : vector<64x64xf32> to vector<64x64xbf16>
    %cst_13 = arith.constant dense<0.000000e+00> : vector<32x64xf32>
    %20 = tpu.matmul %18, %19, %cst_13 {dimension_numbers = #tpu.dot_dimension_numbers<[1], [0], [0], [1], [0, 0, 1, 1], [], []>} : vector<32x64xbf16>, vector<64x64xbf16>, vector<32x64xf32> -> vector<32x64xf32>
    %c0_14 = arith.constant 0 : index
    %c0_15 = arith.constant 0 : index
    %21 = vector.load %arg7[%c0_14, %c0_15] : memref<32x1xf32, #tpu.memory_space<vmem>>, vector<32x1xf32>
    %22 = vector.broadcast %21 : vector<32x1xf32> to vector<32x64xf32>
    %23 = arith.addf %20, %22 : vector<32x64xf32>
    %cst_16 = arith.constant 0.000000e+00 : f32
    %24 = vector.broadcast %cst_16 : f32 to vector<32x64xf32>
    %25 = arith.maximumf %23, %24 : vector<32x64xf32>
    %c0_17 = arith.constant 0 : index
    %c0_18 = arith.constant 0 : index
    %26 = vector.load %arg8[%c0_17, %c0_18] : memref<16x32xbf16, #tpu.memory_space<vmem>>, vector<16x32xbf16>
    %27 = arith.truncf %25 : vector<32x64xf32> to vector<32x64xbf16>
    %cst_19 = arith.constant dense<0.000000e+00> : vector<16x64xf32>
    %28 = tpu.matmul %26, %27, %cst_19 {dimension_numbers = #tpu.dot_dimension_numbers<[1], [0], [0], [1], [0, 0, 1, 1], [], []>} : vector<16x32xbf16>, vector<32x64xbf16>, vector<16x64xf32> -> vector<16x64xf32>
    %c0_20 = arith.constant 0 : index
    %c0_21 = arith.constant 0 : index
    %29 = vector.load %arg9[%c0_20, %c0_21] : memref<16x1xf32, #tpu.memory_space<vmem>>, vector<16x1xf32>
    %30 = vector.broadcast %29 : vector<16x1xf32> to vector<16x64xf32>
    %31 = arith.addf %28, %30 : vector<16x64xf32>
    %c0_22 = arith.constant 0 : index
    %c0_23 = arith.constant 0 : index
    %32 = vector.load %arg10[%c0_22, %c0_23] : memref<16x64xf32, #tpu.memory_space<vmem>>, vector<16x64xf32>
    tpu.vector_store %arg10[%c0_22, %c0_23], %31 {strides = array<i32>} : memref<16x64xf32, #tpu.memory_space<vmem>>, vector<16x64xf32>,
    return
  }
  func.func @transform_0(%arg0: i32) -> (i32, i32) {
    %c0_i32 = arith.constant 0 : i32
    %c0_i32_0 = arith.constant 0 : i32
    return %c0_i32, %arg0 : i32, i32
  }
  func.func @transform_1(%arg0: i32) -> (i32, i32) {
    %c0_i32 = arith.constant 0 : i32
    %c0_i32_0 = arith.constant 0 : i32
    %c0_i32_1 = arith.constant 0 : i32
    return %c0_i32, %c0_i32_0 : i32, i32
  }
  func.func @transform_2(%arg0: i32) -> (i32, i32) {
    %c0_i32 = arith.constant 0 : i32
    %c0_i32_0 = arith.constant 0 : i32
    %c0_i32_1 = arith.constant 0 : i32
    return %c0_i32, %c0_i32_0 : i32, i32
  }
  func.func @transform_3(%arg0: i32) -> (i32, i32) {
    %c0_i32 = arith.constant 0 : i32
    %c0_i32_0 = arith.constant 0 : i32
    %c0_i32_1 = arith.constant 0 : i32
    return %c0_i32, %c0_i32_0 : i32, i32
  }
  func.func @transform_4(%arg0: i32) -> (i32, i32) {
    %c0_i32 = arith.constant 0 : i32
    %c0_i32_0 = arith.constant 0 : i32
    %c0_i32_1 = arith.constant 0 : i32
    return %c0_i32, %c0_i32_0 : i32, i32
  }
  func.func @transform_5(%arg0: i32) -> (i32, i32) {
    %c0_i32 = arith.constant 0 : i32
    %c0_i32_0 = arith.constant 0 : i32
    %c0_i32_1 = arith.constant 0 : i32
    return %c0_i32, %c0_i32_0 : i32, i32
  }
  func.func @transform_6(%arg0: i32) -> (i32, i32) {
    %c0_i32 = arith.constant 0 : i32
    %c0_i32_0 = arith.constant 0 : i32
    %c0_i32_1 = arith.constant 0 : i32
    return %c0_i32, %c0_i32_0 : i32, i32
  }
  func.func @transform_7(%arg0: i32) -> (i32, i32) {
    %c0_i32 = arith.constant 0 : i32
    %c0_i32_0 = arith.constant 0 : i32
    %c0_i32_1 = arith.constant 0 : i32
    return %c0_i32, %c0_i32_0 : i32, i32
  }
  func.func @transform_8(%arg0: i32) -> (i32, i32) {
    %c0_i32 = arith.constant 0 : i32
    %c0_i32_0 = arith.constant 0 : i32
    %c0_i32_1 = arith.constant 0 : i32
    return %c0_i32, %c0_i32_0 : i32, i32
  }
  func.func @transform_9(%arg0: i32) -> (i32, i32) {
    %c0_i32 = arith.constant 0 : i32
    %c0_i32_0 = arith.constant 0 : i32
    return %c0_i32, %arg0 : i32, i32
  }
}

</mosaic_0001>

<bundles_post_ra>
// kernel: tpu_custom_call.1
= control target key start
LH: loop header
LB: loop body
LE: loop exit
PB: predicated region body
PF: predicated region fallthrough
CT: control target
= control target key end

     0   :  { %v551_v2 = vmov 0   ;;  %s718_s0 = inlined_call_operand.vmem [shape: f32[1,64], index: 0, kind: input, shape index: {}]   ;;  %s719_s1 = inlined_call_operand.vmem [shape: f32[32,1], index: 1, kind: input, shape index: {}]   ;;  %s720_s2 = inlined_call_operand.vmem [shape: f32[32,1], index: 2, kind: input, shape index: {}]   ;;  %s721_s3 = inlined_call_operand.vmem [shape: bf16[64,32], index: 3, kind: input, shape index: {}]   ;;  %s722_s4 = inlined_call_operand.vmem [shape: f32[64,1], index: 4, kind: input, shape index: {}]   ;;  %s723_s5 = inlined_call_operand.vmem [shape: bf16[32,64], index: 5, kind: input, shape index: {}]   ;;  %s724_s6 = inlined_call_operand.vmem [shape: f32[32,1], index: 6, kind: input, shape index: {}]   ;;  %s725_s7 = inlined_call_operand.vmem [shape: bf16[16,32], index: 7, kind: input, shape index: {}]   ;;  %s726_s8 = inlined_call_operand.vmem [shape: f32[16,1], index: 8, kind: input, shape index: {}]   ;;  %s727_s9 = inlined_call_operand.hbm [shape: f32[16,64], index: 9, kind: output, shape index: {}]  }
   0x1   :  { %v69_v0 = vld [vmem:[%s720_s2] sm:$0xff]  ;;  %519 = vset.pattern.permute.xlu1 %v551_v2  ;;  %518 = vset.pattern.permute.xlu0 %v551_v2  ;;  %v70_v3 = vld [vmem:[%s720_s2 + $0x8] sm:$0xff]  ;;  %v38_v5 = vld [vmem:[%s719_s1 + $0x18] sm:$0xff] }
   0x2   :  { %v35_v1 = vld [vmem:[%s719_s1] sm:$0xff]  ;;  %75 = vperm.xlu1 %519, %v69_v0   ;;  %v36_v4 = vld [vmem:[%s719_s1 + $0x8] sm:$0xff]  ;;  %v37_v6 = vld [vmem:[%s719_s1 + $0x10] sm:$0xff] }
   0x3   :  { %41 = vperm.xlu0 %518, %v35_v1   ;;  %v72_v7 = vld [vmem:[%s720_s2 + $0x18] sm:$0xff]  ;;  %v71_v8 = vld [vmem:[%s720_s2 + $0x10] sm:$0xff] }
   0x6   :  { %80 = vperm.xlu1 %519, %v70_v3  }
   0x7   :  { %46 = vperm.xlu0 %518, %v36_v4  }
   0xa   :  { %56 = vperm.xlu1 %519, %v38_v5  }
   0xb   :  { %51 = vperm.xlu0 %518, %v37_v6  }
   0xc   :  { %14 = vsyncpa [#allocation3], 0  ;;  %v112_v9 = vld [vmem:[%s722_s4 + $0x8] sm:$0xff]  ;;  %v111_v10 = vld [vmem:[%s722_s4] sm:$0xff]  ;;  %vm179_vm0 = vcmask 261120   ;;  %vm307_vm1 = vcmask 523264  }
   0xd   :  { %v114_v11 = vld [vmem:[%s722_s4 + $0x18] sm:$0xff]  ;;  %v113_v12 = vld [vmem:[%s722_s4 + $0x10] sm:$0xff]  ;;  %v520_v13 = vld [vmem:[%s721_s3] sm:$0xff]   ;;  %vm553_vm2 = vmmov 0   ;;  %s554_s17 = smov [#allocation2]  }
   0xe   :  { %90 = vperm.xlu1 %519, %v72_v7   ;;  %v116_v14 = vld [vmem:[%s722_s4 + $0x28] sm:$0xff]  ;;  %v115_v15 = vld [vmem:[%s722_s4 + $0x20] sm:$0xff]  ;;  %484 = vmatprep.mubr.msk.bf16.mxu0 %vm179_vm0, %v520_v13  ;;  %v118_v16 = vld [vmem:[%s722_s4 + $0x38] sm:$0xff]  ;;  %s439_s18 = sshll.u32 %s554_s17, 4  ;;  %s440_s18 = int_to_ptr.vmem [resolvable:$true] %s439_s18 }
   0xf   :  { %85 = vperm.xlu0 %518, %v71_v8   ;;  %v117_v17 = vld [vmem:[%s722_s4 + $0x30] sm:$0xff]  ;;  %v274_v18 = vld [vmem:[%s724_s6 + $0x8] sm:$0xff]  ;;  %v273_v19 = vld [vmem:[%s724_s6] sm:$0xff]  ;;  %s527_s19 = scalar_lea.vmem %s440_s18, 256  ;;  %p532_p1 = scmp.lt.s32.totalorder %s440_s18, %s440_s18 }
  0x10   :  { %v276_v20 = vld [vmem:[%s724_s6 + $0x18] sm:$0xff]  ;;  %v275_v21 = vld [vmem:[%s724_s6 + $0x10] sm:$0xff]  ;;  %v372_v22 = vld [vmem:[%s726_s8 + $0x8] sm:$0xff]  ;;  %p528_p0 = scmp.ne.s32.totalorder %s440_s18, %s527_s19  ;;  %p533_p2 = scmp.lt.s32.totalorder %s527_s19, %s527_s19 }
  0x11   :  { %v371_v23 = vld [vmem:[%s726_s8] sm:$0xff]  ;;  %v521_v47 = vld [vmem:[%s721_s3 + $0x8] sm:$0xff]   ;;  %v522_v48 = vld [vmem:[%s721_s3 + $0x10] sm:$0xff]  }
  0x12   :  { %126 = vperm.xlu1 %519, %v112_v9   ;;  %v450_v24 = vld [vmem:[%s718_s0] ss:$0 sm:$0xff]  ;;  %v523_v49 = vld [vmem:[%s721_s3 + $0x18] sm:$0xff]   ;;  %p534_p3 = por %p533_p2, %p532_p1 }
  0x13   :  { %121 = vperm.xlu0 %518, %v111_v10   ;;  %v524_v50 = vld [vmem:[%s723_s5] sm:$0xff]  }
  0x14   :  { %500 = vmatprep.mubr.msk.bf16.mxu1 %vm307_vm1, %v524_v50  ;;  %p535_p4 = pnand %p534_p3, %p528_p0 }
  0x16   :  { %136 = vperm.xlu1 %519, %v114_v11  }
  0x17   :  { %131 = vperm.xlu0 %518, %v113_v12  }
  0x1a   :  { %146 = vperm.xlu1 %519, %v116_v14  }
  0x1b   :  { %141 = vperm.xlu0 %518, %v115_v15  }
  0x1e   :  { %156 = vperm.xlu1 %519, %v118_v16  }
  0x1f   :  { %151 = vperm.xlu0 %518, %v117_v17  }
  0x22   :  { %284 = vperm.xlu1 %519, %v274_v18  }
  0x23   :  { %279 = vperm.xlu0 %518, %v273_v19  }
  0x26   :  { %294 = vperm.xlu1 %519, %v276_v20  }
  0x27   :  { %289 = vperm.xlu0 %518, %v275_v21  }
  0x2a   :  { %380 = vperm.xlu1 %519, %v372_v22  }
  0x2b   :  { %375 = vperm.xlu0 %518, %v371_v23   ;;  %v525_v23 = vld [vmem:[%s723_s5 + $0x8] sm:$0xff]  }
  0x81   :  { %v76_v25 = vpop.permute.xlu1 %75 }
  0x82   :  { %v42_v26 = vpop.permute.xlu0 %41 }
  0x83   :  { %v65_v27 = vmul.f32 %v450_v24, %v42_v26 }
  0x85   :  { %v81_v28 = vpop.permute.xlu1 %80  ;;  %v93_v30 = vadd.f32 %v76_v25, %v65_v27 }
  0x86   :  { %v47_v29 = vpop.permute.xlu0 %46 }
  0x87   :  { %v66_v31 = vmul.f32 %v450_v24, %v47_v29  ;;  %v97_v35 = vmax.f32 %v93_v30, 0.0 }
  0x89   :  { %v94_v32 = vadd.f32 %v81_v28, %v66_v31  ;;  %v57_v33 = vpop.permute.xlu1 %56 }
  0x8a   :  { %v52_v34 = vpop.permute.xlu0 %51  ;;  %v68_v37 = vmul.f32 %v450_v24, %v57_v33 }
  0x8b   :  { %v98_v36 = vmax.f32 %v94_v32, 0.0  ;;  %v67_v38 = vmul.f32 %v450_v24, %v52_v34  ;;  %v552_v24 = vmov 0.0  }
  0x8d   :  { %v109_v39 = vpack.c.bf16 %v98_v36, %v97_v35  ;;  %v91_v40 = vpop.permute.xlu1 %90 }
  0x8e   :  { %v86_v41 = vpop.permute.xlu0 %85  ;;  %v96_v42 = vadd.f32 %v91_v40, %v68_v37 }
  0x8f   :  { %v95_v43 = vadd.f32 %v86_v41, %v67_v38  ;;  %480 = vmatprep.subr.bf16.mxu0 %v109_v39 }
  0x90   :  { %481 = vmatpush3.bf16.msra.mxu0 %v109_v39  ;;  %v100_v44 = vmax.f32 %v96_v42, 0.0 }
  0x91   :  { %v99_v45 = vmax.f32 %v95_v43, 0.0  ;;  %v127_v52 = vpop.permute.xlu1 %126  ;;  %v526_v43 = vld [vmem:[%s725_s7] sm:$0xff]  }
  0x92   :  { %v122_v51 = vpop.permute.xlu0 %121 }
  0x93   :  { %v110_v46 = vpack.c.bf16 %v100_v44, %v99_v45 }
  0x95   :  { %482 = vmatprep.subr.bf16.mxu0 %v110_v46  ;;  %v137_v54 = vpop.permute.xlu1 %136 }
  0x96   :  { %483 = vmatpush3.bf16.msra.mxu0 %v110_v46  ;;  %v132_v53 = vpop.permute.xlu0 %131 }
  0x97   :  { %504 = vmatprep.subr.bf16.mxu0 %v552_v24 }
  0x99   :  { %485 = vmatmul.mubr.msk.bf16.vlgmr.msra.gmra.mrb[0].mxu0 %vm179_vm0, %v521_v47  ;;  %v147_v63 = vpop.permute.xlu1 %146 }
  0x9a   :  { %488 = vmatprep.mubr.msk.bf16.mxu0 %vm179_vm0, %v522_v48  ;;  %v142_v58 = vpop.permute.xlu0 %141 }
  0x9d   :  { %v157_v11 = vpop.permute.xlu1 %156 }
  0x9e   :  { %v152_v6 = vpop.permute.xlu0 %151 }
  0xa1   :  { %489 = vmatmul.mubr.msk.bf16.gmra.mrb[4].mxu0 %vm179_vm0, %v523_v49  ;;  %v285_v26 = vpop.permute.xlu1 %284 }
  0xa2   :  { %508 = vmatprep.mubr.msk.bf16.mxu0 %vm553_vm2, %v552_v24  ;;  %v280_v25 = vpop.permute.xlu0 %279 }
  0xa5   :  { %v295_v31 = vpop.permute.xlu1 %294 }
  0xa6   :  { %v290_v27 = vpop.permute.xlu0 %289 }
  0xa9   :  { %v381_v48 = vpop.permute.xlu1 %380 }
  0xaa   :  { %v376_v44 = vpop.permute.xlu0 %375 }
 0x16c   :  { %v486_v55 = vpop.f32.mrb[0].mxu0 }
 0x16d   :  { %v235_v56 = vadd.f32 %v486_v55, %v132_v53  ;;  %v226_v57 = vpop.f32.mrb[1].mxu0 }
 0x16e   :  { %v227_v59 = vadd.f32 %v226_v57, %v122_v51  ;;  %v487_v60 = vpop.f32.mrb[2].mxu0 }
 0x16f   :  { %v238_v61 = vadd.f32 %v487_v60, %v137_v54  ;;  %v229_v62 = vpop.f32.mrb[3].mxu0  ;;  %v259_v1 = vmax.f32 %v235_v56, 0.0 }
 0x170   :  { %v230_v0 = vadd.f32 %v229_v62, %v127_v52  ;;  %v257_v3 = vmax.f32 %v227_v59, 0.0 }
 0x171   :  { %v260_v2 = vmax.f32 %v238_v61, 0.0 }
 0x172   :  { %v258_v4 = vmax.f32 %v230_v0, 0.0 }
 0x173   :  { %v270_v5 = vpack.c.bf16 %v260_v2, %v259_v1 }
 0x174   :  { %v490_v7 = vpop.f32.mrb[4].mxu0  ;;  %v269_v8 = vpack.c.bf16 %v258_v4, %v257_v3 }
 0x175   :  { %v251_v9 = vadd.f32 %v490_v7, %v152_v6  ;;  %v242_v10 = vpop.f32.mrb[5].mxu0 }
 0x176   :  { %v243_v12 = vadd.f32 %v242_v10, %v142_v58  ;;  %v491_v13 = vpop.f32.mrb[6].mxu0  ;;  %492 = vmatprep.subr.bf16.mxu1 %v269_v8 }
 0x177   :  { %v254_v14 = vadd.f32 %v491_v13, %v157_v11  ;;  %v245_v15 = vpop.f32.mrb[7].mxu0  ;;  %493 = vmatpush3.bf16.msra.mxu1 %v269_v8  ;;  %v263_v17 = vmax.f32 %v251_v9, 0.0 }
 0x178   :  { %v246_v16 = vadd.f32 %v245_v15, %v147_v63  ;;  %494 = vmatprep.subr.bf16.mxu1 %v270_v5  ;;  %v261_v19 = vmax.f32 %v243_v12, 0.0 }
 0x179   :  { %v264_v18 = vmax.f32 %v254_v14, 0.0 }
 0x17a   :  { %v262_v20 = vmax.f32 %v246_v16, 0.0 }
 0x17b   :  { %v272_v21 = vpack.c.bf16 %v264_v18, %v263_v17  ;;  %495 = vmatpush3.bf16.msra.mxu1 %v270_v5 }
 0x17c   :  { %v271_v22 = vpack.c.bf16 %v262_v20, %v261_v19 }
 0x17e   :  { %496 = vmatprep.subr.bf16.mxu1 %v271_v22 }
 0x17f   :  { %497 = vmatpush3.bf16.msra.mxu1 %v271_v22 }
 0x180   :  { %498 = vmatprep.subr.bf16.mxu1 %v272_v21 }
 0x183   :  { %499 = vmatpush3.bf16.msra.mxu1 %v272_v21 }
 0x186   :  { %501 = vmatmul.mubr.msk.bf16.vlgmr.msra.gmra.mrb[0].mxu1 %vm307_vm1, %v525_v23 }
 0x259   :  { %v502_v28 = vpop.f32.mrb[0].mxu1 }
 0x25a   :  { %v357_v29 = vadd.f32 %v502_v28, %v290_v27  ;;  %v348_v30 = vpop.f32.mrb[1].mxu1 }
 0x25b   :  { %v349_v32 = vadd.f32 %v348_v30, %v280_v25  ;;  %v503_v33 = vpop.f32.mrb[2].mxu1 }
 0x25c   :  { %v360_v34 = vadd.f32 %v503_v33, %v295_v31  ;;  %v351_v35 = vpop.f32.mrb[3].mxu1  ;;  %v365_v37 = vmax.f32 %v357_v29, 0.0 }
 0x25d   :  { %v352_v36 = vadd.f32 %v351_v35, %v285_v26  ;;  %v363_v39 = vmax.f32 %v349_v32, 0.0 }
 0x25e   :  { %v366_v38 = vmax.f32 %v360_v34, 0.0 }
 0x25f   :  { %v364_v40 = vmax.f32 %v352_v36, 0.0 }
 0x260   :  { %v370_v41 = vpack.c.bf16 %v366_v38, %v365_v37 }
 0x261   :  { %v369_v42 = vpack.c.bf16 %v364_v40, %v363_v39 }
 0x263   :  { %505 = vmatpush3.bf16.msra.mxu0 %v369_v42 }
 0x264   :  { %506 = vmatprep.subr.bf16.mxu0 %v552_v24 }
 0x267   :  { %507 = vmatpush3.bf16.msra.mxu0 %v370_v41 }
 0x26a   :  { %509 = vmatmul.mubr.msk.bf16.vlgmr.msra.gmra.mrb[8].mxu0 %vm179_vm0, %v526_v43 }
 0x33d   :  { %v425_v45 = vpop.f32.mrb[8].mxu0 }
 0x33e   :  { %v426_v46 = vadd.f32 %v425_v45, %v376_v44  ;;  %v510_v47 = vpop.f32.mrb[9].mxu0 }
 0x33f   :  { %v428_v49 = vpop.f32.mrb[10].mxu0 }
 0x340   :  { %432 = vst.msk [vmem:[#allocation2] sm:$0xff] %vm307_vm1, %v426_v46  ;;  %v429_v50 = vadd.f32 %v428_v49, %v381_v48  ;;  %v511_v51 = vpop.f32.mrb[11].mxu0 }
 0x342   :  { %433 = vst.msk [vmem:[#allocation2 + $0x8] sm:$0xff] %vm307_vm1, %v429_v50 }
 0x343   :  { %538 = shalt.err (!%p535_p4)
}
 0x344   :  { %s539_s21 = scalar_lea.hbm %s727_s9, 256 }
 0x345   :  { %p540_p5 = scmp.ne.s32.totalorder %s727_s9, %s539_s21  ;;  %p543_p6 = scmp.lt.u32.totalorder %s539_s21, %s727_s9 }
 0x347   :  { %p545_p7 = pnand %p543_p6, %p540_p5 }
 0x349   :  { %548 = shalt.err (!%p545_p7)
}
 0x34a   :  { %s555_s26 = smov 128   ;;  %s556_s27 = smov 8  }
 0x34b   :  { %445 = dma.vmem_to_hbm [thread:$0]  %s440_s18, 256, %s727_s9, [#allocation3], %s555_s26, %s555_s26, %s556_s27  }
 0x34c   :  { %549 = dma.done.wait [#allocation3], 256  }
 0x34d   :  { %550 = vsyncadd [#allocation3], 4294967040 }
 0x34e   :  { %449 = vsyncpa [#allocation3], 1 }

</bundles_post_ra>
